<compile_context>
chip_gen: v7x
topology: tpu7x:2x2x1
jax: 0.10.0
libtpu: 0.0.40
codegen_flags: <defaults>
</compile_context>

<pallas_src>
import functools

import jax
import jax.numpy as jnp
from jax.experimental import pallas as pl
from jax.experimental.pallas import tpu as pltpu

_EPS = 1e-5


def _pack_stage_params(w, b, g, be, n_batch):
    """Pack one conv+BN stage into a lane-dense (N*C, K*K*N*C + 3) block.

    Rows follow the activation slab ordering r = n*C + co.  Columns are
    tap-major: for tap t = kh*K + kw, columns [t*N*C, (t+1)*N*C) hold
    kron(I_N, A_t) with A_t[co, ci] = w[co, ci, kh, kw].  The kron(I_N, .)
    structure makes this block the exact LHS of the kernel's single im2col
    matmul (input rows of batch n only feed output rows of batch n).
      col K*K*N*C     : conv bias b[co]
      col K*K*N*C + 1 : BN gamma g[co]
      col K*K*N*C + 2 : BN beta  be[co]
    """
    c_out, c_in, k, _ = w.shape
    eye = jnp.eye(n_batch, dtype=jnp.float32)
    blocks = [jnp.kron(eye, w[:, :, kh, kw].astype(jnp.float32))
              for kh in range(k) for kw in range(k)]
    wbig = jnp.concatenate(blocks, axis=1)            # (N*C, K*K*N*C)

    def per_row(v):
        return jnp.tile(v.astype(jnp.float32)[:, None], (n_batch, 1))

    return jnp.concatenate([wbig, per_row(b), per_row(g), per_row(be)], axis=1)


def resblock_kernel(x_ref, p1_ref, p2_ref, o_ref, *, N, C, H, W, K):
    """Fused ResBlock forward on one lane-dense (N*C, H*W) activation slab."""
    NC, HW = x_ref.shape
    pad = (K - 1) // 2
    w_cols = K * K * N * C                  # weight columns (tap-major)
    inv_cnt = 1.0 / float(N * H * W)

    x = x_ref[...].astype(jnp.float32)      # one full-tile load; reused as residual
    p1 = p1_ref[...]
    p2 = p2_ref[...]

    # Per-lane (h, w) image coordinates from an integer iota (exact, no f32 div).
    pos = jax.lax.broadcasted_iota(jnp.int32, (1, HW), 1)
    if (W & (W - 1)) == 0:
        h_pos = pos >> (W.bit_length() - 1)
        w_pos = pos & (W - 1)
    else:
        # floor(pos / W) via f32 with an exact integer correction (any W).
        h_pos = jnp.floor(pos.astype(jnp.float32) * (1.0 / W)).astype(jnp.int32)
        h_pos = h_pos - (h_pos * W > pos).astype(jnp.int32)
        h_pos = h_pos + ((h_pos + 1) * W <= pos).astype(jnp.int32)
        w_pos = pos - h_pos * W

    # Boundary masks for every non-center tap, hoisted (shared by both convs).
    masks = {}
    for dh in range(-pad, pad + 1):
        for dw in range(-pad, pad + 1):
            if dh == 0 and dw == 0:
                continue
            masks[(dh, dw)] = ((h_pos >= -dh) & (h_pos < H - dh) &
                               (w_pos >= -dw) & (w_pos < W - dw))

    def conv(src, params):
        """K x K 'same' conv: tap-major im2col slab -> one MXU matmul."""
        wcols = params[:, :w_cols]                    # (NC, K*K*NC)
        brow = params[:, w_cols:w_cols + 1]           # (NC, 1) conv bias
        taps = []
        for kh in range(K):
            dh = kh - pad
            for kw in range(K):
                dw = kw - pad
                s = dh * W + dw                       # lane shift for this tap
                if dh == 0 and dw == 0:
                    taps.append(src)
                else:
                    # shifted[p] = src[p + s]; lanes that wrapped around land
                    # exactly on masked (out-of-image) positions => zero padding.
                    shifted = pltpu.roll(src, shift=(-s) % HW, axis=1)
                    taps.append(jnp.where(masks[(dh, dw)], shifted, 0.0))
        im2col = jnp.concatenate(taps, axis=0)        # (K*K*NC, HW)
        # One MXU matmul does the whole channel mixing for all taps / batches.
        acc = jnp.dot(wcols, im2col, preferred_element_type=jnp.float32)
        return acc + brow

    def fold_batch(a):
        """Sum over the N batch copies of each channel row (rows r = n*C + c).

        Rotate-adds along sublanes; the result is already replicated across all
        N copies, so mean/scale need no concat re-broadcast.
        """
        if N == 1:
            return a
        if (N & (N - 1)) == 0:                        # power-of-two: log2(N) steps
            shift = C
            while shift < NC:
                a = a + pltpu.roll(a, shift=shift, axis=0)
                shift *= 2
            return a
        acc = a                                       # general N: N-1 rotate-adds
        for i in range(1, N):
            acc = acc + pltpu.roll(a, shift=i * C, axis=0)
        return acc

    def bn(y, params):
        """Training-mode BatchNorm2d: per-channel batch mean / biased var, affine."""
        grow = params[:, w_cols + 1:w_cols + 2]       # (NC, 1) gamma
        berow = params[:, w_cols + 2:w_cols + 3]      # (NC, 1) beta
        s1 = jnp.sum(fold_batch(y), axis=1, keepdims=True)       # (NC, 1)
        s2 = jnp.sum(fold_batch(y * y), axis=1, keepdims=True)   # (NC, 1)
        mean = s1 * inv_cnt
        var = s2 * inv_cnt - mean * mean              # biased variance
        scale = jax.lax.rsqrt(var + _EPS) * grow      # rsqrt -> EUP
        return (y - mean) * scale + berow

    y = jnp.maximum(bn(conv(x, p1), p1), 0.0)         # conv1 -> bn1 -> relu
    y = bn(conv(y, p2), p2) + x                       # conv2 -> bn2 -> +x
    o_ref[...] = jnp.maximum(y, 0.0).astype(o_ref.dtype)   # one unmasked full store


def _resblock_pallas(x_slabs, p1, p2, *, N, C, H, W, K):
    """Run the fused ResBlock on G independent (N*C, H*W) activation slabs."""
    G, NC, HW = x_slabs.shape
    kernel = functools.partial(resblock_kernel, N=N, C=C, H=H, W=W, K=K)
    return pl.pallas_call(
        kernel,
        out_shape=jax.ShapeDtypeStruct((G, NC, HW), x_slabs.dtype),
        grid=(G,),
        in_specs=[
            pl.BlockSpec((None, NC, HW), lambda g: (g, 0, 0)),
            pl.BlockSpec(p1.shape, lambda g: (0, 0)),   # resident across grid steps
            pl.BlockSpec(p2.shape, lambda g: (0, 0)),
        ],
        out_specs=pl.BlockSpec((None, NC, HW), lambda g: (g, 0, 0)),
        # The kernel reads its x block fully into vregs before the single final
        # store, so writing the output in place over the input slab is safe.
        input_output_aliases={0: 0},
        compiler_params=pltpu.CompilerParams(
            dimension_semantics=("parallel",)),   # v7x: instances split across both TCs
    )(x_slabs, p1, p2)


def resblock_forward_batched(xs, params):
    """G independent ResBlock forward passes; xs: (G, N, C, H, W).

    BN statistics are computed per instance (each instance is one module call).
    """
    G, N, C, H, W = xs.shape
    K = params["w1"].shape[-1]
    p1 = _pack_stage_params(params["w1"], params["b1"], params["g1"], params["be1"], N)
    p2 = _pack_stage_params(params["w2"], params["b2"], params["g2"], params["be2"], N)
    slabs = xs.reshape(G, N * C, H * W)     # free reshape -> lane-dense slabs
    out = _resblock_pallas(slabs, p1, p2, N=N, C=C, H=H, W=W, K=K)
    return out.reshape(G, N, C, H, W)


def resblock_forward(x, params):
    """Single ResBlock forward matching the PyTorch module (x: (N, C, H, W))."""
    return resblock_forward_batched(x[None], params)[0]


def resblock_reference(x, p):
    """Pure-JAX reference matching the PyTorch forward (train-mode BN)."""
    K = p["w1"].shape[-1]
    pad = (K - 1) // 2

    def conv(x, w, b):
        y = jax.lax.conv_general_dilated(
            x, w, window_strides=(1, 1), padding=[(pad, pad), (pad, pad)],
            dimension_numbers=("NCHW", "OIHW", "NCHW"))
        return y + b[None, :, None, None]

    def bn(y, g, be):
        mean = y.mean(axis=(0, 2, 3), keepdims=True)
        var = ((y - mean) ** 2).mean(axis=(0, 2, 3), keepdims=True)
        return ((y - mean) * jax.lax.rsqrt(var + _EPS)
                * g[None, :, None, None] + be[None, :, None, None])

    y = jax.nn.relu(bn(conv(x, p["w1"], p["b1"]), p["g1"], p["be1"]))
    y = bn(conv(y, p["w2"], p["b2"]), p["g2"], p["be2"]) + x
    return jax.nn.relu(y)


if __name__ == "__main__":
    N, C, H, W, K = 2, 4, 16, 16, 3   # nb_channels=4, kernel_size=3

    key = jax.random.PRNGKey(0)
    ks = jax.random.split(key, 10)

    x = jax.random.normal(ks[0], (N, C, H, W), jnp.float32)

    # Deterministic synthetic parameters (shapes match nn.Conv2d / nn.BatchNorm2d).
    params = {
        "w1": 0.1 * jax.random.normal(ks[1], (C, C, K, K), jnp.float32),  # OIHW
        "b1": 0.05 * jax.random.normal(ks[2], (C,), jnp.float32),
        "g1": 1.0 + 0.1 * jax.random.normal(ks[3], (C,), jnp.float32),
        "be1": 0.1 * jax.random.normal(ks[4], (C,), jnp.float32),
        "w2": 0.1 * jax.random.normal(ks[5], (C, C, K, K), jnp.float32),
        "b2": 0.05 * jax.random.normal(ks[6], (C,), jnp.float32),
        "g2": 1.0 + 0.1 * jax.random.normal(ks[7], (C,), jnp.float32),
        "be2": 0.1 * jax.random.normal(ks[8], (C,), jnp.float32),
    }

    # Single-instance forward (the module's semantics).
    out = jax.block_until_ready(jax.jit(resblock_forward)(x, params))
    ref = resblock_reference(x, params)
    err = float(jnp.max(jnp.abs(out - ref)))
    # MXU multiply precision can differ slightly across TPU generations; 1e-2
    # is still far below the O(0.1+) error any logic bug would produce.
    assert err < 1e-2, f"max abs error vs reference: {err}"

    # Batched path: several independent instances per pallas_call (grid axis is
    # "parallel" -> both TensorCores on v7x; pipelined block DMA on all chips).
    xs = jax.random.normal(ks[9], (3, N, C, H, W), jnp.float32)
    out_b = jax.block_until_ready(jax.jit(resblock_forward_batched)(xs, params))
    ref_b = jnp.stack([resblock_reference(xs[g], params) for g in range(xs.shape[0])])
    err_b = float(jnp.max(jnp.abs(out_b - ref_b)))
    assert err_b < 1e-2, f"batched max abs error vs reference: {err_b}"

    print("KERNEL_OK")
</pallas_src>

<mosaic_0001>
module attributes {stable_mosaic.version = 11 : i64} {
  func.func @resblock_kernel(%arg0: i32, %arg1: memref<1x8x256xf32, #tpu.memory_space<vmem>>, %arg2: memref<8x75xf32, #tpu.memory_space<vmem>>, %arg3: memref<8x75xf32, #tpu.memory_space<vmem>>, %arg4: memref<1x8x256xf32, #tpu.memory_space<vmem>>) attributes {dimension_semantics = [#tpu.dimension_semantics<parallel>], iteration_bounds = array<i64: 1>, scalar_prefetch = 0 : i64, scratch_operands = 0 : i64, tpu.core_type = #tpu.core_type<tc>, window_params = [{transform_indices = @transform_0, window_bounds = array<i64: 1, 8, 256>}, {pipeline_mode = #tpu.pipeline_mode<synchronous>, transform_indices = @transform_1, window_bounds = array<i64: 8, 75>}, {pipeline_mode = #tpu.pipeline_mode<synchronous>, transform_indices = @transform_2, window_bounds = array<i64: 8, 75>}, {transform_indices = @transform_3, window_bounds = array<i64: 1, 8, 256>}]} {
    %c0 = arith.constant 0 : index
    %c0_0 = arith.constant 0 : index
    %c0_1 = arith.constant 0 : index
    %0 = vector.load %arg1[%c0, %c0_0, %c0_1] : memref<1x8x256xf32, #tpu.memory_space<vmem>>, vector<1x8x256xf32>
    %1 = vector.shape_cast %0 : vector<1x8x256xf32> to vector<8x256xf32>
    %c0_2 = arith.constant 0 : index
    %c0_3 = arith.constant 0 : index
    %2 = vector.load %arg2[%c0_2, %c0_3] : memref<8x75xf32, #tpu.memory_space<vmem>>, vector<8x75xf32>
    %c0_4 = arith.constant 0 : index
    %c0_5 = arith.constant 0 : index
    %3 = vector.load %arg3[%c0_4, %c0_5] : memref<8x75xf32, #tpu.memory_space<vmem>>, vector<8x75xf32>
    %4 = tpu.iota {dimensions = array<i32: 1>} : vector<1x256xi32>
    %c4_i32 = arith.constant 4 : i32
    %5 = vector.broadcast %c4_i32 : i32 to vector<1x256xi32>
    %6 = arith.shrsi %4, %5 : vector<1x256xi32>
    %c15_i32 = arith.constant 15 : i32
    %7 = vector.broadcast %c15_i32 : i32 to vector<1x256xi32>
    %8 = arith.andi %4, %7 : vector<1x256xi32>
    %c1_i32 = arith.constant 1 : i32
    %9 = vector.broadcast %c1_i32 : i32 to vector<1x256xi32>
    %10 = arith.cmpi sge, %6, %9 : vector<1x256xi32>
    %c17_i32 = arith.constant 17 : i32
    %11 = vector.broadcast %c17_i32 : i32 to vector<1x256xi32>
    %12 = arith.cmpi slt, %6, %11 : vector<1x256xi32>
    %13 = arith.andi %10, %12 : vector<1x256xi1>
    %c1_i32_6 = arith.constant 1 : i32
    %14 = vector.broadcast %c1_i32_6 : i32 to vector<1x256xi32>
    %15 = arith.cmpi sge, %8, %14 : vector<1x256xi32>
    %16 = arith.andi %13, %15 : vector<1x256xi1>
    %c17_i32_7 = arith.constant 17 : i32
    %17 = vector.broadcast %c17_i32_7 : i32 to vector<1x256xi32>
    %18 = arith.cmpi slt, %8, %17 : vector<1x256xi32>
    %19 = arith.andi %16, %18 : vector<1x256xi1>
    %c1_i32_8 = arith.constant 1 : i32
    %20 = vector.broadcast %c1_i32_8 : i32 to vector<1x256xi32>
    %21 = arith.cmpi sge, %6, %20 : vector<1x256xi32>
    %c17_i32_9 = arith.constant 17 : i32
    %22 = vector.broadcast %c17_i32_9 : i32 to vector<1x256xi32>
    %23 = arith.cmpi slt, %6, %22 : vector<1x256xi32>
    %24 = arith.andi %21, %23 : vector<1x256xi1>
    %c0_i32 = arith.constant 0 : i32
    %25 = vector.broadcast %c0_i32 : i32 to vector<1x256xi32>
    %26 = arith.cmpi sge, %8, %25 : vector<1x256xi32>
    %27 = arith.andi %24, %26 : vector<1x256xi1>
    %c16_i32 = arith.constant 16 : i32
    %28 = vector.broadcast %c16_i32 : i32 to vector<1x256xi32>
    %29 = arith.cmpi slt, %8, %28 : vector<1x256xi32>
    %30 = arith.andi %27, %29 : vector<1x256xi1>
    %c1_i32_10 = arith.constant 1 : i32
    %31 = vector.broadcast %c1_i32_10 : i32 to vector<1x256xi32>
    %32 = arith.cmpi sge, %6, %31 : vector<1x256xi32>
    %c17_i32_11 = arith.constant 17 : i32
    %33 = vector.broadcast %c17_i32_11 : i32 to vector<1x256xi32>
    %34 = arith.cmpi slt, %6, %33 : vector<1x256xi32>
    %35 = arith.andi %32, %34 : vector<1x256xi1>
    %c-1_i32 = arith.constant -1 : i32
    %36 = vector.broadcast %c-1_i32 : i32 to vector<1x256xi32>
    %37 = arith.cmpi sge, %8, %36 : vector<1x256xi32>
    %38 = arith.andi %35, %37 : vector<1x256xi1>
    %c15_i32_12 = arith.constant 15 : i32
    %39 = vector.broadcast %c15_i32_12 : i32 to vector<1x256xi32>
    %40 = arith.cmpi slt, %8, %39 : vector<1x256xi32>
    %41 = arith.andi %38, %40 : vector<1x256xi1>
    %c0_i32_13 = arith.constant 0 : i32
    %42 = vector.broadcast %c0_i32_13 : i32 to vector<1x256xi32>
    %43 = arith.cmpi sge, %6, %42 : vector<1x256xi32>
    %c16_i32_14 = arith.constant 16 : i32
    %44 = vector.broadcast %c16_i32_14 : i32 to vector<1x256xi32>
    %45 = arith.cmpi slt, %6, %44 : vector<1x256xi32>
    %46 = arith.andi %43, %45 : vector<1x256xi1>
    %c1_i32_15 = arith.constant 1 : i32
    %47 = vector.broadcast %c1_i32_15 : i32 to vector<1x256xi32>
    %48 = arith.cmpi sge, %8, %47 : vector<1x256xi32>
    %49 = arith.andi %46, %48 : vector<1x256xi1>
    %c17_i32_16 = arith.constant 17 : i32
    %50 = vector.broadcast %c17_i32_16 : i32 to vector<1x256xi32>
    %51 = arith.cmpi slt, %8, %50 : vector<1x256xi32>
    %52 = arith.andi %49, %51 : vector<1x256xi1>
    %c0_i32_17 = arith.constant 0 : i32
    %53 = vector.broadcast %c0_i32_17 : i32 to vector<1x256xi32>
    %54 = arith.cmpi sge, %6, %53 : vector<1x256xi32>
    %c16_i32_18 = arith.constant 16 : i32
    %55 = vector.broadcast %c16_i32_18 : i32 to vector<1x256xi32>
    %56 = arith.cmpi slt, %6, %55 : vector<1x256xi32>
    %57 = arith.andi %54, %56 : vector<1x256xi1>
    %c-1_i32_19 = arith.constant -1 : i32
    %58 = vector.broadcast %c-1_i32_19 : i32 to vector<1x256xi32>
    %59 = arith.cmpi sge, %8, %58 : vector<1x256xi32>
    %60 = arith.andi %57, %59 : vector<1x256xi1>
    %c15_i32_20 = arith.constant 15 : i32
    %61 = vector.broadcast %c15_i32_20 : i32 to vector<1x256xi32>
    %62 = arith.cmpi slt, %8, %61 : vector<1x256xi32>
    %63 = arith.andi %60, %62 : vector<1x256xi1>
    %c-1_i32_21 = arith.constant -1 : i32
    %64 = vector.broadcast %c-1_i32_21 : i32 to vector<1x256xi32>
    %65 = arith.cmpi sge, %6, %64 : vector<1x256xi32>
    %c15_i32_22 = arith.constant 15 : i32
    %66 = vector.broadcast %c15_i32_22 : i32 to vector<1x256xi32>
    %67 = arith.cmpi slt, %6, %66 : vector<1x256xi32>
    %68 = arith.andi %65, %67 : vector<1x256xi1>
    %c1_i32_23 = arith.constant 1 : i32
    %69 = vector.broadcast %c1_i32_23 : i32 to vector<1x256xi32>
    %70 = arith.cmpi sge, %8, %69 : vector<1x256xi32>
    %71 = arith.andi %68, %70 : vector<1x256xi1>
    %c17_i32_24 = arith.constant 17 : i32
    %72 = vector.broadcast %c17_i32_24 : i32 to vector<1x256xi32>
    %73 = arith.cmpi slt, %8, %72 : vector<1x256xi32>
    %74 = arith.andi %71, %73 : vector<1x256xi1>
    %c-1_i32_25 = arith.constant -1 : i32
    %75 = vector.broadcast %c-1_i32_25 : i32 to vector<1x256xi32>
    %76 = arith.cmpi sge, %6, %75 : vector<1x256xi32>
    %c15_i32_26 = arith.constant 15 : i32
    %77 = vector.broadcast %c15_i32_26 : i32 to vector<1x256xi32>
    %78 = arith.cmpi slt, %6, %77 : vector<1x256xi32>
    %79 = arith.andi %76, %78 : vector<1x256xi1>
    %c0_i32_27 = arith.constant 0 : i32
    %80 = vector.broadcast %c0_i32_27 : i32 to vector<1x256xi32>
    %81 = arith.cmpi sge, %8, %80 : vector<1x256xi32>
    %82 = arith.andi %79, %81 : vector<1x256xi1>
    %c16_i32_28 = arith.constant 16 : i32
    %83 = vector.broadcast %c16_i32_28 : i32 to vector<1x256xi32>
    %84 = arith.cmpi slt, %8, %83 : vector<1x256xi32>
    %85 = arith.andi %82, %84 : vector<1x256xi1>
    %c-1_i32_29 = arith.constant -1 : i32
    %86 = vector.broadcast %c-1_i32_29 : i32 to vector<1x256xi32>
    %87 = arith.cmpi sge, %6, %86 : vector<1x256xi32>
    %c15_i32_30 = arith.constant 15 : i32
    %88 = vector.broadcast %c15_i32_30 : i32 to vector<1x256xi32>
    %89 = arith.cmpi slt, %6, %88 : vector<1x256xi32>
    %90 = arith.andi %87, %89 : vector<1x256xi1>
    %c-1_i32_31 = arith.constant -1 : i32
    %91 = vector.broadcast %c-1_i32_31 : i32 to vector<1x256xi32>
    %92 = arith.cmpi sge, %8, %91 : vector<1x256xi32>
    %93 = arith.andi %90, %92 : vector<1x256xi1>
    %c15_i32_32 = arith.constant 15 : i32
    %94 = vector.broadcast %c15_i32_32 : i32 to vector<1x256xi32>
    %95 = arith.cmpi slt, %8, %94 : vector<1x256xi32>
    %96 = arith.andi %93, %95 : vector<1x256xi1>
    %97 = vector.extract_strided_slice %2 {offsets = [0, 0], sizes = [8, 72], strides = [1, 1]} : vector<8x75xf32> to vector<8x72xf32>
    %98 = vector.extract_strided_slice %2 {offsets = [0, 72], sizes = [8, 1], strides = [1, 1]} : vector<8x75xf32> to vector<8x1xf32>
    %c17_i32_33 = arith.constant 17 : i32
    %99 = tpu.dynamic_rotate %1 by %c17_i32_33 dim 1 : vector<8x256xf32>, i32 -> vector<8x256xf32>
    %cst = arith.constant 0.000000e+00 : f32
    %100 = vector.shape_cast %19 : vector<1x256xi1> to vector<1x256xi1>
    %101 = vector.broadcast %100 : vector<1x256xi1> to vector<8x256xi1>
    %102 = vector.broadcast %cst : f32 to vector<8x256xf32>
    %103 = arith.select %101, %99, %102 : vector<8x256xi1>, vector<8x256xf32>
    %c16_i32_34 = arith.constant 16 : i32
    %104 = tpu.dynamic_rotate %1 by %c16_i32_34 dim 1 : vector<8x256xf32>, i32 -> vector<8x256xf32>
    %cst_35 = arith.constant 0.000000e+00 : f32
    %105 = vector.shape_cast %30 : vector<1x256xi1> to vector<1x256xi1>
    %106 = vector.broadcast %105 : vector<1x256xi1> to vector<8x256xi1>
    %107 = vector.broadcast %cst_35 : f32 to vector<8x256xf32>
    %108 = arith.select %106, %104, %107 : vector<8x256xi1>, vector<8x256xf32>
    %c15_i32_36 = arith.constant 15 : i32
    %109 = tpu.dynamic_rotate %1 by %c15_i32_36 dim 1 : vector<8x256xf32>, i32 -> vector<8x256xf32>
    %cst_37 = arith.constant 0.000000e+00 : f32
    %110 = vector.shape_cast %41 : vector<1x256xi1> to vector<1x256xi1>
    %111 = vector.broadcast %110 : vector<1x256xi1> to vector<8x256xi1>
    %112 = vector.broadcast %cst_37 : f32 to vector<8x256xf32>
    %113 = arith.select %111, %109, %112 : vector<8x256xi1>, vector<8x256xf32>
    %c1_i32_38 = arith.constant 1 : i32
    %114 = tpu.dynamic_rotate %1 by %c1_i32_38 dim 1 : vector<8x256xf32>, i32 -> vector<8x256xf32>
    %cst_39 = arith.constant 0.000000e+00 : f32
    %115 = vector.shape_cast %52 : vector<1x256xi1> to vector<1x256xi1>
    %116 = vector.broadcast %115 : vector<1x256xi1> to vector<8x256xi1>
    %117 = vector.broadcast %cst_39 : f32 to vector<8x256xf32>
    %118 = arith.select %116, %114, %117 : vector<8x256xi1>, vector<8x256xf32>
    %c255_i32 = arith.constant 255 : i32
    %119 = tpu.dynamic_rotate %1 by %c255_i32 dim 1 : vector<8x256xf32>, i32 -> vector<8x256xf32>
    %cst_40 = arith.constant 0.000000e+00 : f32
    %120 = vector.shape_cast %63 : vector<1x256xi1> to vector<1x256xi1>
    %121 = vector.broadcast %120 : vector<1x256xi1> to vector<8x256xi1>
    %122 = vector.broadcast %cst_40 : f32 to vector<8x256xf32>
    %123 = arith.select %121, %119, %122 : vector<8x256xi1>, vector<8x256xf32>
    %c241_i32 = arith.constant 241 : i32
    %124 = tpu.dynamic_rotate %1 by %c241_i32 dim 1 : vector<8x256xf32>, i32 -> vector<8x256xf32>
    %cst_41 = arith.constant 0.000000e+00 : f32
    %125 = vector.shape_cast %74 : vector<1x256xi1> to vector<1x256xi1>
    %126 = vector.broadcast %125 : vector<1x256xi1> to vector<8x256xi1>
    %127 = vector.broadcast %cst_41 : f32 to vector<8x256xf32>
    %128 = arith.select %126, %124, %127 : vector<8x256xi1>, vector<8x256xf32>
    %c240_i32 = arith.constant 240 : i32
    %129 = tpu.dynamic_rotate %1 by %c240_i32 dim 1 : vector<8x256xf32>, i32 -> vector<8x256xf32>
    %cst_42 = arith.constant 0.000000e+00 : f32
    %130 = vector.shape_cast %85 : vector<1x256xi1> to vector<1x256xi1>
    %131 = vector.broadcast %130 : vector<1x256xi1> to vector<8x256xi1>
    %132 = vector.broadcast %cst_42 : f32 to vector<8x256xf32>
    %133 = arith.select %131, %129, %132 : vector<8x256xi1>, vector<8x256xf32>
    %c239_i32 = arith.constant 239 : i32
    %134 = tpu.dynamic_rotate %1 by %c239_i32 dim 1 : vector<8x256xf32>, i32 -> vector<8x256xf32>
    %cst_43 = arith.constant 0.000000e+00 : f32
    %135 = vector.shape_cast %96 : vector<1x256xi1> to vector<1x256xi1>
    %136 = vector.broadcast %135 : vector<1x256xi1> to vector<8x256xi1>
    %137 = vector.broadcast %cst_43 : f32 to vector<8x256xf32>
    %138 = arith.select %136, %134, %137 : vector<8x256xi1>, vector<8x256xf32>
    %139 = tpu.concatenate %103, %108, %113, %118, %1, %123, %128, %133, %138 in 0 : vector<8x256xf32>, vector<8x256xf32>, vector<8x256xf32>, vector<8x256xf32>, vector<8x256xf32>, vector<8x256xf32>, vector<8x256xf32>, vector<8x256xf32>, vector<8x256xf32> -> vector<72x256xf32>
    %cst_44 = arith.constant dense<0.000000e+00> : vector<8x256xf32>
    %140 = tpu.matmul %97, %139, %cst_44 {dimension_numbers = #tpu.dot_dimension_numbers<[1], [0], [0], [1], [0, 0, 1, 1], [], []>} : vector<8x72xf32>, vector<72x256xf32>, vector<8x256xf32> -> vector<8x256xf32>
    %141 = vector.broadcast %98 : vector<8x1xf32> to vector<8x256xf32>
    %142 = arith.addf %140, %141 : vector<8x256xf32>
    %143 = vector.extract_strided_slice %2 {offsets = [0, 73], sizes = [8, 1], strides = [1, 1]} : vector<8x75xf32> to vector<8x1xf32>
    %144 = vector.extract_strided_slice %2 {offsets = [0, 74], sizes = [8, 1], strides = [1, 1]} : vector<8x75xf32> to vector<8x1xf32>
    %c4_i32_45 = arith.constant 4 : i32
    %145 = tpu.dynamic_rotate %142 by %c4_i32_45 dim 0 : vector<8x256xf32>, i32 -> vector<8x256xf32>
    %146 = arith.addf %142, %145 : vector<8x256xf32>
    %cst_46 = arith.constant dense<0.000000e+00> : vector<8xf32>
    %147 = vector.multi_reduction <add>, %146, %cst_46 [1] : vector<8x256xf32> to vector<8xf32>
    %148 = vector.shape_cast %147 : vector<8xf32> to vector<8x1xf32>
    %149 = arith.mulf %142, %142 : vector<8x256xf32>
    %c4_i32_47 = arith.constant 4 : i32
    %150 = tpu.dynamic_rotate %149 by %c4_i32_47 dim 0 : vector<8x256xf32>, i32 -> vector<8x256xf32>
    %151 = arith.addf %149, %150 : vector<8x256xf32>
    %cst_48 = arith.constant dense<0.000000e+00> : vector<8xf32>
    %152 = vector.multi_reduction <add>, %151, %cst_48 [1] : vector<8x256xf32> to vector<8xf32>
    %153 = vector.shape_cast %152 : vector<8xf32> to vector<8x1xf32>
    %cst_49 = arith.constant 0.001953125 : f32
    %154 = vector.broadcast %cst_49 : f32 to vector<8x1xf32>
    %155 = arith.mulf %148, %154 : vector<8x1xf32>
    %cst_50 = arith.constant 0.001953125 : f32
    %156 = vector.broadcast %cst_50 : f32 to vector<8x1xf32>
    %157 = arith.mulf %153, %156 : vector<8x1xf32>
    %158 = arith.mulf %155, %155 : vector<8x1xf32>
    %159 = arith.subf %157, %158 : vector<8x1xf32>
    %cst_51 = arith.constant 9.99999974E-6 : f32
    %160 = vector.broadcast %cst_51 : f32 to vector<8x1xf32>
    %161 = arith.addf %159, %160 : vector<8x1xf32>
    %162 = math.rsqrt %161 : vector<8x1xf32>
    %163 = arith.mulf %162, %143 : vector<8x1xf32>
    %164 = vector.broadcast %155 : vector<8x1xf32> to vector<8x256xf32>
    %165 = arith.subf %142, %164 : vector<8x256xf32>
    %166 = vector.broadcast %163 : vector<8x1xf32> to vector<8x256xf32>
    %167 = arith.mulf %165, %166 : vector<8x256xf32>
    %168 = vector.broadcast %144 : vector<8x1xf32> to vector<8x256xf32>
    %169 = arith.addf %167, %168 : vector<8x256xf32>
    %cst_52 = arith.constant 0.000000e+00 : f32
    %170 = vector.broadcast %cst_52 : f32 to vector<8x256xf32>
    %171 = arith.maximumf %169, %170 : vector<8x256xf32>
    %172 = vector.extract_strided_slice %3 {offsets = [0, 0], sizes = [8, 72], strides = [1, 1]} : vector<8x75xf32> to vector<8x72xf32>
    %173 = vector.extract_strided_slice %3 {offsets = [0, 72], sizes = [8, 1], strides = [1, 1]} : vector<8x75xf32> to vector<8x1xf32>
    %c17_i32_53 = arith.constant 17 : i32
    %174 = tpu.dynamic_rotate %171 by %c17_i32_53 dim 1 : vector<8x256xf32>, i32 -> vector<8x256xf32>
    %cst_54 = arith.constant 0.000000e+00 : f32
    %175 = vector.shape_cast %19 : vector<1x256xi1> to vector<1x256xi1>
    %176 = vector.broadcast %175 : vector<1x256xi1> to vector<8x256xi1>
    %177 = vector.broadcast %cst_54 : f32 to vector<8x256xf32>
    %178 = arith.select %176, %174, %177 : vector<8x256xi1>, vector<8x256xf32>
    %c16_i32_55 = arith.constant 16 : i32
    %179 = tpu.dynamic_rotate %171 by %c16_i32_55 dim 1 : vector<8x256xf32>, i32 -> vector<8x256xf32>
    %cst_56 = arith.constant 0.000000e+00 : f32
    %180 = vector.shape_cast %30 : vector<1x256xi1> to vector<1x256xi1>
    %181 = vector.broadcast %180 : vector<1x256xi1> to vector<8x256xi1>
    %182 = vector.broadcast %cst_56 : f32 to vector<8x256xf32>
    %183 = arith.select %181, %179, %182 : vector<8x256xi1>, vector<8x256xf32>
    %c15_i32_57 = arith.constant 15 : i32
    %184 = tpu.dynamic_rotate %171 by %c15_i32_57 dim 1 : vector<8x256xf32>, i32 -> vector<8x256xf32>
    %cst_58 = arith.constant 0.000000e+00 : f32
    %185 = vector.shape_cast %41 : vector<1x256xi1> to vector<1x256xi1>
    %186 = vector.broadcast %185 : vector<1x256xi1> to vector<8x256xi1>
    %187 = vector.broadcast %cst_58 : f32 to vector<8x256xf32>
    %188 = arith.select %186, %184, %187 : vector<8x256xi1>, vector<8x256xf32>
    %c1_i32_59 = arith.constant 1 : i32
    %189 = tpu.dynamic_rotate %171 by %c1_i32_59 dim 1 : vector<8x256xf32>, i32 -> vector<8x256xf32>
    %cst_60 = arith.constant 0.000000e+00 : f32
    %190 = vector.shape_cast %52 : vector<1x256xi1> to vector<1x256xi1>
    %191 = vector.broadcast %190 : vector<1x256xi1> to vector<8x256xi1>
    %192 = vector.broadcast %cst_60 : f32 to vector<8x256xf32>
    %193 = arith.select %191, %189, %192 : vector<8x256xi1>, vector<8x256xf32>
    %c255_i32_61 = arith.constant 255 : i32
    %194 = tpu.dynamic_rotate %171 by %c255_i32_61 dim 1 : vector<8x256xf32>, i32 -> vector<8x256xf32>
    %cst_62 = arith.constant 0.000000e+00 : f32
    %195 = vector.shape_cast %63 : vector<1x256xi1> to vector<1x256xi1>
    %196 = vector.broadcast %195 : vector<1x256xi1> to vector<8x256xi1>
    %197 = vector.broadcast %cst_62 : f32 to vector<8x256xf32>
    %198 = arith.select %196, %194, %197 : vector<8x256xi1>, vector<8x256xf32>
    %c241_i32_63 = arith.constant 241 : i32
    %199 = tpu.dynamic_rotate %171 by %c241_i32_63 dim 1 : vector<8x256xf32>, i32 -> vector<8x256xf32>
    %cst_64 = arith.constant 0.000000e+00 : f32
    %200 = vector.shape_cast %74 : vector<1x256xi1> to vector<1x256xi1>
    %201 = vector.broadcast %200 : vector<1x256xi1> to vector<8x256xi1>
    %202 = vector.broadcast %cst_64 : f32 to vector<8x256xf32>
    %203 = arith.select %201, %199, %202 : vector<8x256xi1>, vector<8x256xf32>
    %c240_i32_65 = arith.constant 240 : i32
    %204 = tpu.dynamic_rotate %171 by %c240_i32_65 dim 1 : vector<8x256xf32>, i32 -> vector<8x256xf32>
    %cst_66 = arith.constant 0.000000e+00 : f32
    %205 = vector.shape_cast %85 : vector<1x256xi1> to vector<1x256xi1>
    %206 = vector.broadcast %205 : vector<1x256xi1> to vector<8x256xi1>
    %207 = vector.broadcast %cst_66 : f32 to vector<8x256xf32>
    %208 = arith.select %206, %204, %207 : vector<8x256xi1>, vector<8x256xf32>
    %c239_i32_67 = arith.constant 239 : i32
    %209 = tpu.dynamic_rotate %171 by %c239_i32_67 dim 1 : vector<8x256xf32>, i32 -> vector<8x256xf32>
    %cst_68 = arith.constant 0.000000e+00 : f32
    %210 = vector.shape_cast %96 : vector<1x256xi1> to vector<1x256xi1>
    %211 = vector.broadcast %210 : vector<1x256xi1> to vector<8x256xi1>
    %212 = vector.broadcast %cst_68 : f32 to vector<8x256xf32>
    %213 = arith.select %211, %209, %212 : vector<8x256xi1>, vector<8x256xf32>
    %214 = tpu.concatenate %178, %183, %188, %193, %171, %198, %203, %208, %213 in 0 : vector<8x256xf32>, vector<8x256xf32>, vector<8x256xf32>, vector<8x256xf32>, vector<8x256xf32>, vector<8x256xf32>, vector<8x256xf32>, vector<8x256xf32>, vector<8x256xf32> -> vector<72x256xf32>
    %cst_69 = arith.constant dense<0.000000e+00> : vector<8x256xf32>
    %215 = tpu.matmul %172, %214, %cst_69 {dimension_numbers = #tpu.dot_dimension_numbers<[1], [0], [0], [1], [0, 0, 1, 1], [], []>} : vector<8x72xf32>, vector<72x256xf32>, vector<8x256xf32> -> vector<8x256xf32>
    %216 = vector.broadcast %173 : vector<8x1xf32> to vector<8x256xf32>
    %217 = arith.addf %215, %216 : vector<8x256xf32>
    %218 = vector.extract_strided_slice %3 {offsets = [0, 73], sizes = [8, 1], strides = [1, 1]} : vector<8x75xf32> to vector<8x1xf32>
    %219 = vector.extract_strided_slice %3 {offsets = [0, 74], sizes = [8, 1], strides = [1, 1]} : vector<8x75xf32> to vector<8x1xf32>
    %c4_i32_70 = arith.constant 4 : i32
    %220 = tpu.dynamic_rotate %217 by %c4_i32_70 dim 0 : vector<8x256xf32>, i32 -> vector<8x256xf32>
    %221 = arith.addf %217, %220 : vector<8x256xf32>
    %cst_71 = arith.constant dense<0.000000e+00> : vector<8xf32>
    %222 = vector.multi_reduction <add>, %221, %cst_71 [1] : vector<8x256xf32> to vector<8xf32>
    %223 = vector.shape_cast %222 : vector<8xf32> to vector<8x1xf32>
    %224 = arith.mulf %217, %217 : vector<8x256xf32>
    %c4_i32_72 = arith.constant 4 : i32
    %225 = tpu.dynamic_rotate %224 by %c4_i32_72 dim 0 : vector<8x256xf32>, i32 -> vector<8x256xf32>
    %226 = arith.addf %224, %225 : vector<8x256xf32>
    %cst_73 = arith.constant dense<0.000000e+00> : vector<8xf32>
    %227 = vector.multi_reduction <add>, %226, %cst_73 [1] : vector<8x256xf32> to vector<8xf32>
    %228 = vector.shape_cast %227 : vector<8xf32> to vector<8x1xf32>
    %cst_74 = arith.constant 0.001953125 : f32
    %229 = vector.broadcast %cst_74 : f32 to vector<8x1xf32>
    %230 = arith.mulf %223, %229 : vector<8x1xf32>
    %cst_75 = arith.constant 0.001953125 : f32
    %231 = vector.broadcast %cst_75 : f32 to vector<8x1xf32>
    %232 = arith.mulf %228, %231 : vector<8x1xf32>
    %233 = arith.mulf %230, %230 : vector<8x1xf32>
    %234 = arith.subf %232, %233 : vector<8x1xf32>
    %cst_76 = arith.constant 9.99999974E-6 : f32
    %235 = vector.broadcast %cst_76 : f32 to vector<8x1xf32>
    %236 = arith.addf %234, %235 : vector<8x1xf32>
    %237 = math.rsqrt %236 : vector<8x1xf32>
    %238 = arith.mulf %237, %218 : vector<8x1xf32>
    %239 = vector.broadcast %230 : vector<8x1xf32> to vector<8x256xf32>
    %240 = arith.subf %217, %239 : vector<8x256xf32>
    %241 = vector.broadcast %238 : vector<8x1xf32> to vector<8x256xf32>
    %242 = arith.mulf %240, %241 : vector<8x256xf32>
    %243 = vector.broadcast %219 : vector<8x1xf32> to vector<8x256xf32>
    %244 = arith.addf %242, %243 : vector<8x256xf32>
    %245 = arith.addf %244, %1 : vector<8x256xf32>
    %cst_77 = arith.constant 0.000000e+00 : f32
    %246 = vector.broadcast %cst_77 : f32 to vector<8x256xf32>
    %247 = arith.maximumf %245, %246 : vector<8x256xf32>
    %c0_78 = arith.constant 0 : index
    %c0_79 = arith.constant 0 : index
    %c0_80 = arith.constant 0 : index
    %248 = vector.load %arg4[%c0_78, %c0_79, %c0_80] : memref<1x8x256xf32, #tpu.memory_space<vmem>>, vector<1x8x256xf32>
    %249 = vector.shape_cast %248 : vector<1x8x256xf32> to vector<8x256xf32>
    %250 = vector.shape_cast %247 : vector<8x256xf32> to vector<1x8x256xf32>
    tpu.vector_store %arg4[%c0_78, %c0_79, %c0_80], %250 {strides = array<i32>} : memref<1x8x256xf32, #tpu.memory_space<vmem>>, vector<1x8x256xf32>,
    return
  }
  func.func @transform_0(%arg0: i32) -> (i32, i32, i32) {
    %c0_i32 = arith.constant 0 : i32
    %c0_i32_0 = arith.constant 0 : i32
    %c0_i32_1 = arith.constant 0 : i32
    return %arg0, %c0_i32, %c0_i32_0 : i32, i32, i32
  }
  func.func @transform_1(%arg0: i32) -> (i32, i32) {
    %c0_i32 = arith.constant 0 : i32
    %c0_i32_0 = arith.constant 0 : i32
    %c0_i32_1 = arith.constant 0 : i32
    return %c0_i32, %c0_i32_0 : i32, i32
  }
  func.func @transform_2(%arg0: i32) -> (i32, i32) {
    %c0_i32 = arith.constant 0 : i32
    %c0_i32_0 = arith.constant 0 : i32
    %c0_i32_1 = arith.constant 0 : i32
    return %c0_i32, %c0_i32_0 : i32, i32
  }
  func.func @transform_3(%arg0: i32) -> (i32, i32, i32) {
    %c0_i32 = arith.constant 0 : i32
    %c0_i32_0 = arith.constant 0 : i32
    %c0_i32_1 = arith.constant 0 : i32
    return %arg0, %c0_i32, %c0_i32_0 : i32, i32, i32
  }
}

</mosaic_0001>

<bundles_post_ra>
// kernel: resblock_forward.1
= control target key start
LH: loop header
LB: loop body
LE: loop exit
PB: predicated region body
PF: predicated region fallthrough
CT: control target
= control target key end

     0   :  { %s675_s16 = smov 15   ;;  %s676_s17 = smov 17   ;;  %v683_v3 = vmov 0.0   ;;  %v684_v5 = vmov 72   ;;  %v18_v6 = vlaneseq  ;;  %v1108_v17 = vmov 0  ;;  %s1084_s0 = inlined_call_operand.vmem [shape: f32[1,8,256], index: 0, kind: input, shape index: {}, may-alias: {0,3}]   ;;  %s1085_s1 = inlined_call_operand.vmem [shape: f32[8,75], index: 1, kind: input, shape index: {}]   ;;  %s1086_s2 = inlined_call_operand.vmem [shape: f32[8,75], index: 2, kind: input, shape index: {}]   ;;  %s1087_s3 = inlined_call_operand.vmem [shape: f32[1,8,256], index: 3, kind: output, shape index: {}, may-alias: {0,3}]  }
   0x1   :  { %v711_v0 = vld [vmem:[%s1084_s0] sm:$0xff]  ;;  %v716_v1 = vld [vmem:[%s1084_s0 + $0x8] sm:$0xff]  ;;  %s677_s18 = smov 1   ;;  %s678_s19 = smov 16   ;;  %263 = vmatprep.mubr.f32.mxu0 %v683_v3  ;;  %445 = vmatprep.mubr.f32.mxu1 %v683_v3  ;;  %v1112_v21 = vmov 0  ;;  %v1122_v41 = vmov 0 }
   0x2   :  { %v605_v2 = vpack.i.bf16 %v716_v1, %v711_v0  ;;  %s679_s20 = smov 127   ;;  %s680_s0 = smov 113   ;;  %v732_v4 = vld [vmem:[%s1085_s1] sm:$0xff]  ;;  %630 = vset.pattern.permute.xlu1 %v684_v5  ;;  %v738_v7 = vand.u32 127, %v18_v6 }
   0x3   :  { %s681_s21 = smov 112   ;;  %s682_s22 = smov 111  }
   0x4   :  { %606 = vrot.lane.b32.xlu1 %v605_v2, %s675_s16  ;;  %596 = vrot.lane.b32.xlu0 %v605_v2, %s676_s17  ;;  %v20_v8 = vadd.s32 128, %v738_v7  ;;  %v744_v10 = vshra.s32 %v738_v7, 4  ;;  %v23_v12 = vand.u32 15, %v738_v7 }
   0x6   :  { %v741_v9 = vshra.s32 %v20_v8, 4  ;;  %v24_v11 = vand.u32 15, %v20_v8  ;;  %vm25_vm2 = vcmp.ge.s32.totalorder %v744_v10, 1  ;;  %vm27_vm3 = vcmp.lt.s32.totalorder %v744_v10, 17 }
   0x7   :  { %vm759_vm6 = vmand %vm25_vm2, %vm27_vm3  ;;  %vm763_vm7 = vcmp.ge.s32.totalorder %v23_v12, 1  ;;  %vm55_vm15 = vcmp.ge.s32.totalorder %v744_v10, 0  ;;  %vm799_vm2 = vcmp.lt.s32.totalorder %v23_v12, 15 }
   0x8   :  { %611 = vrot.lane.b32.xlu1 %v605_v2, %s677_s18  ;;  %601 = vrot.lane.b32.xlu0 %v605_v2, %s678_s19  ;;  %vm26_vm0 = vcmp.ge.s32.totalorder %v741_v9, 1  ;;  %vm28_vm1 = vcmp.lt.s32.totalorder %v741_v9, 17  ;;  %vm755_vm5 = vcmp.ge.s32.totalorder %v24_v11, 1  ;;  %vm33_vm9 = vmand %vm759_vm6, %vm763_vm7  ;;  %vm56_vm10 = vcmp.ge.s32.totalorder %v741_v9, 0 }
   0x9   :  { %vm751_vm4 = vmand %vm26_vm0, %vm28_vm1  ;;  %vm58_vm11 = vcmp.lt.s32.totalorder %v741_v9, 16  ;;  %vm783_vm13 = vcmp.lt.s32.totalorder %v24_v11, 15  ;;  %vm57_vm0 = vcmp.lt.s32.totalorder %v744_v10, 16 }
   0xa   :  { %vm34_vm8 = vmand %vm751_vm4, %vm755_vm5 }
   0xb   :  { %vm779_vm12 = vmpackc.low %vm751_vm4, %vm34_vm8  ;;  %vm1090_vm8 = vcmp.lt.s32.totalorder %v738_v7, 15 }
   0xc   :  { %616 = vrot.lane.b32.xlu0 %v605_v2, %s679_s20  ;;  %621 = vrot.lane.b32.xlu1 %v605_v2, %s680_s0  ;;  %v1109_v17 = vsel %vm779_vm12, 4294967295, %v1108_v17  ;;  %vm789_vm14 = vmpackc.low %vm759_vm6, %vm33_vm9  ;;  %vm1091_vm9 = vcmp.lt.s32.totalorder %v738_v7, 17 }
   0xd   :  { %v1113_v21 = vsel %vm789_vm14, 4294967295, %v1112_v21  ;;  %vm795_vm1 = vmand %vm56_vm10, %vm58_vm11  ;;  %vm1093_vm11 = vcmp.lt.s32.totalorder %v738_v7, 1  ;;  %vm1092_vm14 = vcmp.lt.s32.totalorder %v738_v7, 16 }
   0xe   :  { %vm809_vm10 = vmand %vm55_vm15, %vm57_vm0 }
   0xf   :  { %vm53_vm15 = vmand %vm759_vm6, %vm799_vm2  ;;  %vm1127_vm6 = vnez %v1109_v17 }
  0x10   :  { %626 = vrot.lane.b32.xlu0 %v605_v2, %s681_s21  ;;  %178 = vrot.lane.b32.xlu1 %v711_v0, %s682_s22  ;;  %vm61_vm0 = vmand %vm809_vm10, %vm763_vm7 }
  0x11   :  { %vm1121_vm12 = vmand %vm795_vm1, %vm755_vm5 }
  0x14   :  { %180 = vrot.lane.b32.xlu0 %v716_v1, %s682_s22  ;;  %193 = vperm.xlu1 %630, %v732_v4  }
  0x76   :  { %v607_v19 = vpop.permute.xlu1 %606  ;;  %v597_v20 = vpop.permute.xlu0 %596 }
  0x77   :  { %v609_v24 = vunpack.i.h.bf16 %v607_v19  ;;  %v608_v25 = vunpack.i.l.bf16 %v607_v19  ;;  %v599_v26 = vunpack.i.h.bf16 %v597_v20  ;;  %v598_v27 = vunpack.i.l.bf16 %v597_v20 }
  0x79   :  { %v118_v35 = vsel %vm1090_vm8, %v608_v25, %v609_v24  ;;  %v92_v36 = vsel %vm1091_vm9, %v598_v27, %v599_v26  ;;  %v93_v39 = vsel %vm1091_vm9, %v599_v26, %v598_v27  ;;  %vm1120_vm8 = vmand %vm751_vm4, %vm783_vm13  ;;  %vm1128_vm4 = vcmp.lt.s32.totalorder %v741_v9, 15 }
  0x7a   :  { %v612_v29 = vpop.permute.xlu1 %611  ;;  %v602_v30 = vpop.permute.xlu0 %601  ;;  %vm851_vm3 = vmpackc.low %vm1121_vm12, %vm1120_vm8  ;;  %vm1126_vm8 = vcmp.lt.s32.totalorder %v738_v7, 15  ;;  %vm1132_vm9 = vnez %v1113_v21 }
  0x7b   :  { %v614_v31 = vunpack.i.h.bf16 %v612_v29  ;;  %v613_v32 = vunpack.i.l.bf16 %v612_v29  ;;  %v604_v33 = vunpack.i.h.bf16 %v602_v30  ;;  %v603_v34 = vunpack.i.l.bf16 %v602_v30  ;;  %vm870_vm12 = vmpackc.low %vm61_vm0, %vm53_vm15 }
  0x7c   :  { %v1123_v41 = vsel %vm851_vm3, 4294967295, %v1122_v41  ;;  %v119_v51 = vsel %vm1126_vm8, %v609_v24, %v608_v25  ;;  %vm1129_vm15 = vcmp.ge.s32.totalorder %v741_v9, 4294967295  ;;  %vm1133_vm8 = vcmp.lt.s32.totalorder %v738_v7, 127 }
  0x7d   :  { %v131_v37 = vsel %vm1093_vm11, %v613_v32, %v614_v31  ;;  %v105_v38 = vsel %vm1092_vm14, %v603_v34, %v604_v33  ;;  %v106_v40 = vsel %vm1092_vm14, %v604_v33, %v603_v34  ;;  %v132_v52 = vsel %vm1093_vm11, %v614_v31, %v613_v32  ;;  %vm885_vm0 = vmand %vm1129_vm15, %vm1128_vm4 }
  0x7e   :  { %v534_v42 = vpack.c.bf16 %v105_v38, %v92_v36  ;;  %v537_v43 = vpack.c.bf16 %v106_v40, %v93_v39  ;;  %v617_v44 = vpop.permute.xlu0 %616  ;;  %v622_v45 = vpop.permute.xlu1 %621  ;;  %v540_v53 = vpack.c.bf16 %v131_v37, %v118_v35  ;;  %vm1094_vm11 = vmmov 1   ;;  %vm1134_vm14 = vmand %vm795_vm1, %vm783_vm13 }
  0x7f   :  { %v619_v46 = vunpack.i.h.bf16 %v617_v44  ;;  %v618_v47 = vunpack.i.l.bf16 %v617_v44  ;;  %v624_v49 = vunpack.i.h.bf16 %v622_v45  ;;  %v623_v50 = vunpack.i.l.bf16 %v622_v45 }
  0x80   :  { %536 = vmatprep.subr.msk.bf16.mxu0 %vm1127_vm6, %v534_v42  ;;  %vm899_vm6 = vmpackc.low %vm1134_vm14, %vm1094_vm11  ;;  %vm69_vm4 = vcmp.ge.s32.totalorder %v744_v10, 4294967295  ;;  %vm71_vm15 = vcmp.lt.s32.totalorder %v744_v10, 15  ;;  %v543_v60 = vpack.c.bf16 %v132_v52, %v119_v51  ;;  %vm1138_vm1 = vcmp.lt.s32.totalorder %v738_v7, 113 }
  0x81   :  { %539 = vmatpush1.bf16.msk.msra.mxu0 %vm1132_vm9, %v537_v43  ;;  %v145_v55 = vsel %vm1133_vm8, %v619_v46, %v618_v47  ;;  %vm1137_vm9 = vmmov %vm1133_vm8  ;;  %vm169_vm8 = vcmp.lt.s32.totalorder %v738_v7, 112  ;;  %v158_v61 = vsel %vm1138_vm1, %v624_v49, %v623_v50  ;;  %v686_v40 = vmov 73  }
  0x82   :  { %v144_v57 = vsel %vm1137_vm9, %v618_v47, %v619_v46  ;;  %v546_v58 = vpack.c.bf16 %v145_v55, %v716_v1  ;;  %542 = vmatprep.subr.msk.bf16.mxu0 %vm851_vm3, %v540_v53  ;;  %v627_v59 = vpop.permute.xlu0 %626  ;;  %vm67_vm14 = vmand %vm809_vm10, %vm799_vm2  ;;  %vm1141_vm10 = vmmov 1   ;;  %vm1144_vm3 = vcmp.lt.s32.totalorder %v738_v7, 113  ;;  %v179_v13 = vpop.permute.xlu1 %178  ;;  %631 = vset.pattern.permute.xlu0 %v686_v40 }
  0x83   :  { %v629_v62 = vunpack.i.h.bf16 %v627_v59  ;;  %v628_v63 = vunpack.i.l.bf16 %v627_v59  ;;  %vm76_vm9 = vmand %vm885_vm0, %vm755_vm5  ;;  %v549_v3 = vpack.c.bf16 %v144_v57, %v711_v0  ;;  %v157_v9 = vsel %vm1144_vm3, %v623_v50, %v624_v49 }
  0x84   :  { %vm921_vm11 = vmand %vm69_vm4, %vm71_vm15  ;;  %vm1099_vm3 = vcmp.lt.s32.totalorder %v738_v7, 111  ;;  %v687_v42 = vmov 74  }
  0x85   :  { %545 = vmatpush1.bf16.msk.msra.mxu0 %vm870_vm12, %v543_v60  ;;  %v171_v6 = vsel %vm169_vm8, %v629_v62, %v628_v63  ;;  %vm931_vm1 = vmpackc.low %vm67_vm14, %vm1141_vm10  ;;  %v170_v10 = vsel %vm169_vm8, %v628_v63, %v629_v62  ;;  %632 = vset.pattern.permute.xlu1 %v687_v42  ;;  %vm1149_vm10 = vcmp.lt.s32.totalorder %v738_v7, 17 }
  0x86   :  { %v552_v11 = vpack.c.bf16 %v171_v6, %v158_v61  ;;  %548 = vmatprep.subr.msk.bf16.mxu0 %vm899_vm6, %v546_v58  ;;  %vm943_vm5 = vmpackc.low %vm885_vm0, %vm76_vm9  ;;  %v181_v14 = vpop.permute.xlu0 %180  ;;  %v555_v15 = vpack.c.bf16 %v170_v10, %v157_v9  ;;  %vm1096_vm9 = vcmask 588800  }
  0x87   :  { %vm75_vm4 = vmand %vm921_vm11, %vm763_vm7  ;;  %v184_v16 = vsel %vm1099_vm3, %v181_v14, %v179_v13  ;;  %v183_v20 = vsel %vm1099_vm3, %v179_v13, %v181_v14  ;;  %vm1154_vm3 = vnez %v1113_v21 }
  0x88   :  { %vm958_vm15 = vmpackc.low %vm921_vm11, %vm75_vm4  ;;  %vm1150_vm4 = vcmp.lt.s32.totalorder %v738_v7, 16 }
  0x89   :  { %551 = vmatpush1.bf16.msk.msra.mxu0 %vm931_vm1, %v549_v3  ;;  %vm1098_vm7 = vmand %vm885_vm0, %vm783_vm13 }
  0x8a   :  { %554 = vmatprep.subr.msk.bf16.mxu0 %vm943_vm5, %v552_v11  ;;  %vm1097_vm14 = vmand %vm921_vm11, %vm799_vm2 }
  0x8d   :  { %557 = vmatpush1.bf16.msk.msra.mxu0 %vm958_vm15, %v555_v15 }
  0x8e   :  { %514 = vmatprep.subr.msk.mxu0 %vm1098_vm7, %v184_v16  ;;  %vm1153_vm7 = vnez %v1109_v17 }
  0x91   :  { %515 = vmatpush1.msk.msra.mxu0 %vm1097_vm14, %v183_v20  ;;  %vm1152_vm14 = vmmov %vm1150_vm4 }
  0x92   :  { %516 = vmatmul.mubr.msk.f32.vlgmr.msra.gmra.mrb[0].mxu0 %vm1096_vm9, %v732_v4  ;;  %vm1151_vm9 = vmmov %vm1149_vm10 }
  0x93   :  { %v194_v22 = vpop.permute.xlu1 %193 }
 0x165   :  { %v265_v24 = vpop.f32.mrb[0].mxu0 }
 0x166   :  { %v266_v25 = vadd.f32 %v265_v24, %v194_v22  ;;  %v267_v26 = vpop.f32.mrb[1].mxu0 }
 0x167   :  { %v268_v27 = vadd.f32 %v267_v26, %v194_v22 }
 0x168   :  { %v270_v28 = vrot.slane %v266_v25, 4  ;;  %v277_v29 = vmul.f32 %v266_v25, %v266_v25 }
 0x169   :  { %v271_v30 = vrot.slane %v268_v27, 4  ;;  %v278_v31 = vmul.f32 %v268_v27, %v268_v27 }
 0x16a   :  { %v272_v32 = vadd.f32 %v270_v28, %v266_v25  ;;  %v279_v33 = vrot.slane %v277_v29, 4 }
 0x16b   :  { %v273_v34 = vadd.f32 %v271_v30, %v268_v27  ;;  %v280_v35 = vrot.slane %v278_v31, 4 }
 0x16c   :  { %v281_v36 = vadd.f32 %v279_v33, %v277_v29 }
 0x16d   :  { %v274_v37 = vadd.f32 %v273_v34, %v272_v32  ;;  %v282_v38 = vadd.f32 %v280_v35, %v278_v31 }
 0x16f   :  { %275 = vadd.xlane.f32.xlu0 %v274_v37  ;;  %v283_v39 = vadd.f32 %v282_v38, %v281_v36 }
 0x171   :  { %284 = vadd.xlane.f32.xlu1 %v283_v39 }
 0x182   :  { %303 = vperm.xlu1 %632, %v732_v4  }
 0x186   :  { %668 = vset.pattern.permute.xlu1 %v684_v5 }
 0x1fc   :  { %v276_v43 = vpop.xlane.xlu0 %275 }
 0x1fd   :  { %v286_v44 = vmul.f32 0.001953125, %v276_v43 }
 0x1fe   :  { %v285_v45 = vpop.xlane.xlu1 %284 }
 0x1ff   :  { %v287_v46 = vmul.f32 0.001953125, %v285_v45  ;;  %v288_v47 = vmul.f32 %v286_v44, %v286_v44  ;;  %v293_v53 = vsub.f32 %v266_v25, %v286_v44  ;;  %v294_v55 = vsub.f32 %v268_v27, %v286_v44 }
 0x201   :  { %v289_v49 = vsub.f32 %v287_v46, %v288_v47 }
 0x202   :  { %v304_v58 = vpop.permute.xlu1 %303 }
 0x203   :  { %v290_v50 = vadd.f32 1e-05, %v289_v49 }
 0x205   :  { %671 = vrsqrt.f32 %v290_v50 }
 0x20f   :  { %v672_v51 = vpop.eup %671 }
 0x210   :  { %v292_v52 = vmul.f32 %v672_v51, %v732_v4  ;;  %v1008_v4 = vld [vmem:[%s1086_s2] sm:$0xff] }
 0x212   :  { %297 = vperm.xlu0 %631, %v292_v52  }
 0x291   :  { %v298_v57 = vpop.permute.xlu0 %297 }
 0x292   :  { %v300_v59 = vmul.f32 %v298_v57, %v293_v53  ;;  %v301_v60 = vmul.f32 %v298_v57, %v294_v55 }
 0x294   :  { %v306_v61 = vadd.f32 %v304_v58, %v300_v59  ;;  %v307_v5 = vadd.f32 %v304_v58, %v301_v60 }
 0x296   :  { %v992_v62 = vmax.f32 %v306_v61, 0.0  ;;  %v309_v63 = vmax.f32 %v307_v5, 0.0 }
 0x298   :  { %v663_v3 = vpack.i.bf16 %v309_v63, %v992_v62 }
 0x29a   :  { %664 = vrot.lane.b32.xlu0 %v663_v3, %s681_s21  ;;  %634 = vrot.lane.b32.xlu1 %v663_v3, %s676_s17 }
 0x29e   :  { %368 = vrot.lane.b32.xlu0 %v309_v63, %s682_s22  ;;  %639 = vrot.lane.b32.xlu1 %v663_v3, %s678_s19 }
 0x2a2   :  { %644 = vrot.lane.b32.xlu1 %v663_v3, %s675_s16 }
 0x2a6   :  { %649 = vrot.lane.b32.xlu1 %v663_v3, %s677_s18 }
 0x2aa   :  { %654 = vrot.lane.b32.xlu1 %v663_v3, %s679_s20 }
 0x2ae   :  { %659 = vrot.lane.b32.xlu1 %v663_v3, %s680_s0 }
 0x2b2   :  { %366 = vrot.lane.b32.xlu1 %v992_v62, %s682_s22 }
 0x2b6   :  { %376 = vperm.xlu1 %668, %v1008_v4  }
 0x2ba   :  { %669 = vset.pattern.permute.xlu1 %v687_v42 }
 0x30c   :  { %v635_v6 = vpop.permute.xlu1 %634  ;;  %v665_v35 = vpop.permute.xlu0 %664 }
 0x30d   :  { %v637_v9 = vunpack.i.h.bf16 %v635_v6  ;;  %v636_v10 = vunpack.i.l.bf16 %v635_v6  ;;  %v667_v40 = vunpack.i.h.bf16 %v665_v35  ;;  %v666_v43 = vunpack.i.l.bf16 %v665_v35 }
 0x30f   :  { %v314_v15 = vsel %vm1149_vm10, %v636_v10, %v637_v9  ;;  %v315_v20 = vsel %vm1151_vm9, %v637_v9, %v636_v10  ;;  %vm1155_vm10 = vcmp.lt.s32.totalorder %v738_v7, 15  ;;  %v363_v52 = vsel %vm169_vm8, %v667_v40, %v666_v43 }
 0x310   :  { %v640_v11 = vpop.permute.xlu1 %639  ;;  %vm1156_vm9 = vmmov %vm1155_vm10  ;;  %v369_v56 = vpop.permute.xlu0 %368 }
 0x311   :  { %v642_v13 = vunpack.i.h.bf16 %v640_v11  ;;  %v641_v14 = vunpack.i.l.bf16 %v640_v11 }
 0x313   :  { %v322_v16 = vsel %vm1150_vm4, %v641_v14, %v642_v13  ;;  %v323_v22 = vsel %vm1152_vm14, %v642_v13, %v641_v14  ;;  %vm1157_vm14 = vcmp.lt.s32.totalorder %v738_v7, 1 }
 0x314   :  { %v645_v24 = vpop.permute.xlu1 %644  ;;  %v558_v25 = vpack.c.bf16 %v322_v16, %v314_v15  ;;  %v561_v26 = vpack.c.bf16 %v323_v22, %v315_v20  ;;  %vm1158_vm4 = vmmov %vm1157_vm14 }
 0x315   :  { %v647_v27 = vunpack.i.h.bf16 %v645_v24  ;;  %v646_v28 = vunpack.i.l.bf16 %v645_v24 }
 0x316   :  { %560 = vmatprep.subr.msk.bf16.mxu1 %vm1153_vm7, %v558_v25  ;;  %vm1160_vm7 = vcmp.lt.s32.totalorder %v738_v7, 127 }
 0x317   :  { %563 = vmatpush1.bf16.msk.msra.mxu1 %vm1154_vm3, %v561_v26  ;;  %v330_v32 = vsel %vm1155_vm10, %v646_v28, %v647_v27  ;;  %v331_v33 = vsel %vm1156_vm9, %v647_v27, %v646_v28  ;;  %vm1159_vm3 = vnez %v1123_v41  ;;  %vm1161_vm10 = vmmov %vm1160_vm7  ;;  %v362_v41 = vsel %vm169_vm8, %v666_v43, %v667_v40 }
 0x318   :  { %v650_v29 = vpop.permute.xlu1 %649  ;;  %vm1162_vm9 = vcmp.lt.s32.totalorder %v738_v7, 113  ;;  %vm1165_vm8 = vmand %vm885_vm0, %vm783_vm13 }
 0x319   :  { %v652_v30 = vunpack.i.h.bf16 %v650_v29  ;;  %v651_v31 = vunpack.i.l.bf16 %v650_v29 }
 0x31b   :  { %v338_v34 = vsel %vm1157_vm14, %v651_v31, %v652_v30  ;;  %v339_v17 = vsel %vm1158_vm4, %v652_v30, %v651_v31  ;;  %vm1168_vm14 = vcmask 588800  }
 0x31c   :  { %v564_v36 = vpack.c.bf16 %v338_v34, %v330_v32  ;;  %v567_v37 = vpack.c.bf16 %v339_v17, %v331_v33  ;;  %v655_v21 = vpop.permute.xlu1 %654 }
 0x31d   :  { %v657_v38 = vunpack.i.h.bf16 %v655_v21  ;;  %v656_v39 = vunpack.i.l.bf16 %v655_v21 }
 0x31e   :  { %566 = vmatprep.subr.msk.bf16.mxu1 %vm1159_vm3, %v564_v36 }
 0x31f   :  { %v346_v44 = vsel %vm1160_vm7, %v656_v39, %v657_v38  ;;  %v347_v45 = vsel %vm1161_vm10, %v657_v38, %v656_v39  ;;  %569 = vmatpush1.bf16.msk.msra.mxu1 %vm870_vm12, %v567_v37  ;;  %vm1163_vm12 = vmmov %vm1162_vm9 }
 0x320   :  { %v570_v46 = vpack.c.bf16 %v347_v45, %v309_v63  ;;  %v573_v47 = vpack.c.bf16 %v346_v44, %v992_v62  ;;  %v660_v49 = vpop.permute.xlu1 %659 }
 0x321   :  { %v662_v50 = vunpack.i.h.bf16 %v660_v49  ;;  %v661_v51 = vunpack.i.l.bf16 %v660_v49 }
 0x322   :  { %572 = vmatprep.subr.msk.bf16.mxu1 %vm899_vm6, %v570_v46  ;;  %vm1164_vm6 = vcmp.lt.s32.totalorder %v738_v7, 111 }
 0x323   :  { %v354_v53 = vsel %vm1162_vm9, %v661_v51, %v662_v50  ;;  %v355_v48 = vsel %vm1163_vm12, %v662_v50, %v661_v51  ;;  %575 = vmatpush1.bf16.msk.msra.mxu1 %vm931_vm1, %v573_v47  ;;  %vm1166_vm1 = vmmov %vm1164_vm6 }
 0x324   :  { %v576_v55 = vpack.c.bf16 %v363_v52, %v355_v48  ;;  %v579_v57 = vpack.c.bf16 %v362_v41, %v354_v53  ;;  %v367_v58 = vpop.permute.xlu1 %366 }
 0x325   :  { %v371_v59 = vsel %vm1164_vm6, %v369_v56, %v367_v58  ;;  %v370_v8 = vsel %vm1166_vm1, %v367_v58, %v369_v56 }
 0x326   :  { %578 = vmatprep.subr.msk.bf16.mxu1 %vm943_vm5, %v576_v55  ;;  %vm1167_vm5 = vmand %vm921_vm11, %vm799_vm2 }
 0x327   :  { %581 = vmatpush1.bf16.msk.msra.mxu1 %vm958_vm15, %v579_v57 }
 0x328   :  { %531 = vmatprep.subr.msk.mxu1 %vm1165_vm8, %v371_v59 }
 0x32b   :  { %532 = vmatpush1.msk.msra.mxu1 %vm1167_vm5, %v370_v8 }
 0x32c   :  { %533 = vmatmul.mubr.msk.f32.vlgmr.msra.gmra.mrb[0].mxu1 %vm1168_vm14, %v1008_v4 }
 0x335   :  { %v377_v12 = vpop.permute.xlu1 %376 }
 0x3ff   :  { %v447_v19 = vpop.f32.mrb[0].mxu1 }
 0x400   :  { %v448_v60 = vadd.f32 %v447_v19, %v377_v12  ;;  %v449_v54 = vpop.f32.mrb[1].mxu1 }
 0x401   :  { %v450_v61 = vadd.f32 %v449_v54, %v377_v12 }
 0x402   :  { %v452_v18 = vrot.slane %v448_v60, 4  ;;  %v459_v5 = vmul.f32 %v448_v60, %v448_v60 }
 0x403   :  { %v453_v62 = vrot.slane %v450_v61, 4  ;;  %v460_v63 = vmul.f32 %v450_v61, %v450_v61 }
 0x404   :  { %v454_v7 = vadd.f32 %v452_v18, %v448_v60  ;;  %v461_v3 = vrot.slane %v459_v5, 4 }
 0x405   :  { %v455_v6 = vadd.f32 %v453_v62, %v450_v61  ;;  %v462_v2 = vrot.slane %v460_v63, 4 }
 0x406   :  { %v463_v9 = vadd.f32 %v461_v3, %v459_v5 }
 0x407   :  { %v456_v23 = vadd.f32 %v455_v6, %v454_v7  ;;  %v464_v10 = vadd.f32 %v462_v2, %v460_v63 }
 0x409   :  { %457 = vadd.xlane.f32.xlu0 %v456_v23  ;;  %v465_v11 = vadd.f32 %v464_v10, %v463_v9 }
 0x40b   :  { %466 = vadd.xlane.f32.xlu1 %v465_v11 }
 0x41c   :  { %485 = vperm.xlu1 %669, %v1008_v4  }
 0x496   :  { %v458_v13 = vpop.xlane.xlu0 %457 }
 0x497   :  { %v468_v14 = vmul.f32 0.001953125, %v458_v13 }
 0x498   :  { %v467_v15 = vpop.xlane.xlu1 %466 }
 0x499   :  { %v469_v16 = vmul.f32 0.001953125, %v467_v15  ;;  %v470_v20 = vmul.f32 %v468_v14, %v468_v14  ;;  %v475_v27 = vsub.f32 %v448_v60, %v468_v14  ;;  %v476_v28 = vsub.f32 %v450_v61, %v468_v14 }
 0x49b   :  { %v471_v22 = vsub.f32 %v469_v16, %v470_v20 }
 0x49c   :  { %v486_v30 = vpop.permute.xlu1 %485 }
 0x49d   :  { %v472_v24 = vadd.f32 1e-05, %v471_v22 }
 0x49f   :  { %673 = vrsqrt.f32 %v472_v24 }
 0x4a9   :  { %v674_v25 = vpop.eup %673 }
 0x4aa   :  { %v474_v26 = vmul.f32 %v674_v25, %v1008_v4 }
 0x4ac   :  { %479 = vperm.xlu0 %631, %v474_v26  }
 0x4b0   :  { %670 = vset.pattern.permute.xlu0 %v687_v42 }
 0x52b   :  { %v480_v29 = vpop.permute.xlu0 %479 }
 0x52c   :  { %v482_v31 = vmul.f32 %v480_v29, %v475_v27  ;;  %v483_v32 = vmul.f32 %v480_v29, %v476_v28 }
 0x52e   :  { %v488_v33 = vadd.f32 %v486_v30, %v482_v31  ;;  %v489_v34 = vadd.f32 %v486_v30, %v483_v32 }
 0x530   :  { %v490_v17 = vadd.f32 %v488_v33, %v711_v0  ;;  %v491_v35 = vadd.f32 %v489_v34, %v716_v1 }
 0x532   :  { %v492_v36 = vmax.f32 %v490_v17, 0.0  ;;  %v493_v37 = vmax.f32 %v491_v35, 0.0 }
 0x534   :  { %494 = vst [vmem:[%s1087_s3] sm:$0xff] %v492_v36  ;;  %495 = vst [vmem:[%s1087_s3 + $0x8] sm:$0xff] %v493_v37 }

</bundles_post_ra>
